<compile_context>
chip_gen: v5e
topology: v5e:2x2
jax: 0.10.0
libtpu: 0.0.40
codegen_flags: <defaults>
</compile_context>

<pallas_src>
import jax
import jax.numpy as jnp
from jax import lax
from jax.experimental import pallas as pl
from jax.experimental.pallas import tpu as pltpu

BN_EPS = 1e-5
LANE = 128


def _round_up(x, m):
    return (x + m - 1) // m * m


def _pick_tile(padded_dim):
    # Prefer 256-wide lane tiles when they divide evenly, else 128.
    return 256 if padded_dim % 256 == 0 else 128


def _linear_bn_relu_kernel(x_ref, w_ref, g_ref, b_ref, h_ref, acc_ref):
    """Stage 1: one (N, tn) hidden-column block; K reduction over in_dim."""
    k = pl.program_id(1)

    @pl.when(k == 0)
    def _init():
        acc_ref[...] = jnp.zeros_like(acc_ref)

    # bf16 operands -> MXU, f32 accumulation.
    acc_ref[...] += jnp.dot(x_ref[...], w_ref[...],
                            preferred_element_type=jnp.float32)

    @pl.when(k == pl.num_programs(1) - 1)
    def _finalize():
        h = acc_ref[...]                                    # f32 (N, tn)
        mean = jnp.mean(h, axis=0, keepdims=True)
        var = jnp.mean((h - mean) ** 2, axis=0, keepdims=True)
        # Fold BN affine into a single per-column scale/shift (mul+add).
        scale = g_ref[...] * lax.rsqrt(var + BN_EPS)
        shift = b_ref[...] - mean * scale
        h_ref[...] = jnp.maximum(h * scale + shift, 0.0).astype(h_ref.dtype)


def _linear_bn_kernel(h_ref, w_ref, o_ref, acc_ref):
    """Stage 2: one (N, tn) output-column block; K reduction over hidden."""
    k = pl.program_id(1)

    @pl.when(k == 0)
    def _init():
        acc_ref[...] = jnp.zeros_like(acc_ref)

    acc_ref[...] += jnp.dot(h_ref[...], w_ref[...],
                            preferred_element_type=jnp.float32)

    @pl.when(k == pl.num_programs(1) - 1)
    def _finalize():
        z = acc_ref[...]                                    # f32 (N, tn)
        mean = jnp.mean(z, axis=0, keepdims=True)
        var = jnp.mean((z - mean) ** 2, axis=0, keepdims=True)
        o_ref[...] = ((z - mean) * lax.rsqrt(var + BN_EPS)).astype(o_ref.dtype)


def projection_mlp(x, w1, gamma1, beta1, w2, *,
                   compute_dtype=jnp.bfloat16, out_dtype=jnp.float32):
    """x: (N, in_dim); w1: (hidden, in_dim); w2: (out, hidden) — PyTorch layouts."""
    n, in_dim = x.shape
    hidden_dim = w1.shape[0]
    out_dim = w2.shape[0]

    in_p = _round_up(in_dim, LANE)
    hid_p = _round_up(hidden_dim, LANE)
    out_p = _round_up(out_dim, LANE)

    # Zero-pad feature dims to lane multiples and pre-transpose weights so the
    # kernels compute x @ W.  Padding is exact: padded x columns / weight rows
    # and columns are zero, so padded activations are identically zero, BN of a
    # zero column stays zero, and the pad is sliced off at the end.
    xp = jnp.zeros((n, in_p), compute_dtype).at[:, :in_dim].set(
        x.astype(compute_dtype))
    w1t = jnp.zeros((in_p, hid_p), compute_dtype).at[:in_dim, :hidden_dim].set(
        jnp.transpose(w1).astype(compute_dtype))
    w2t = jnp.zeros((hid_p, out_p), compute_dtype).at[:hidden_dim, :out_dim].set(
        jnp.transpose(w2).astype(compute_dtype))
    g1 = jnp.ones((1, hid_p), jnp.float32).at[0, :hidden_dim].set(
        gamma1.astype(jnp.float32))
    b1 = jnp.zeros((1, hid_p), jnp.float32).at[0, :hidden_dim].set(
        beta1.astype(jnp.float32))

    tk1 = _pick_tile(in_p)
    tn1 = _pick_tile(hid_p)
    tk2 = _pick_tile(hid_p)
    tn2 = _pick_tile(out_p)

    cparams = pltpu.CompilerParams(
        dimension_semantics=("parallel", "arbitrary"),
        vmem_limit_bytes=32 * 1024 * 1024,
    )

    # ---- Stage 1: h = relu(BN1(x @ W1^T)), tiled over hidden columns ----
    h = pl.pallas_call(
        _linear_bn_relu_kernel,
        out_shape=jax.ShapeDtypeStruct((n, hid_p), compute_dtype),
        grid_spec=pltpu.PrefetchScalarGridSpec(
            num_scalar_prefetch=0,
            grid=(hid_p // tn1, in_p // tk1),
            in_specs=[
                pl.BlockSpec((n, tk1), lambda j, k: (0, k)),     # x cols (K)
                pl.BlockSpec((tk1, tn1), lambda j, k: (k, j)),   # W1 tile
                pl.BlockSpec((1, tn1), lambda j, k: (0, j)),     # gamma
                pl.BlockSpec((1, tn1), lambda j, k: (0, j)),     # beta
            ],
            out_specs=pl.BlockSpec((n, tn1), lambda j, k: (0, j)),
            scratch_shapes=[pltpu.VMEM((n, tn1), jnp.float32)],
        ),
        compiler_params=cparams,
    )(xp, w1t, g1, b1)

    # ---- Stage 2: z = BN2(h @ W2^T), tiled over output columns ----
    z = pl.pallas_call(
        _linear_bn_kernel,
        out_shape=jax.ShapeDtypeStruct((n, out_p), out_dtype),
        grid_spec=pltpu.PrefetchScalarGridSpec(
            num_scalar_prefetch=0,
            grid=(out_p // tn2, hid_p // tk2),
            in_specs=[
                pl.BlockSpec((n, tk2), lambda j, k: (0, k)),     # h cols (K)
                pl.BlockSpec((tk2, tn2), lambda j, k: (k, j)),   # W2 tile
            ],
            out_specs=pl.BlockSpec((n, tn2), lambda j, k: (0, j)),
            scratch_shapes=[pltpu.VMEM((n, tn2), jnp.float32)],
        ),
        compiler_params=cparams,
    )(h, w2t)

    return z[:, :out_dim]


def projection_mlp_ref(x, w1, gamma1, beta1, w2, compute_dtype=jnp.bfloat16):
    """Pure-JAX reference mirroring the PyTorch train-mode forward, using the
    same bf16 matmul-operand precision as the kernel (f32 accumulation / BN)."""
    xd = x.astype(compute_dtype)
    w1d = w1.astype(compute_dtype)
    w2d = w2.astype(compute_dtype)
    h = jnp.dot(xd, w1d.T, preferred_element_type=jnp.float32)
    m = jnp.mean(h, 0)
    v = jnp.mean((h - m) ** 2, 0)
    h = (h - m) * lax.rsqrt(v + BN_EPS) * gamma1 + beta1
    h = jnp.maximum(h, 0.0).astype(compute_dtype)
    z = jnp.dot(h, w2d.T, preferred_element_type=jnp.float32)
    m2 = jnp.mean(z, 0)
    v2 = jnp.mean((z - m2) ** 2, 0)
    return (z - m2) * lax.rsqrt(v2 + BN_EPS)


if __name__ == "__main__":
    # Small demo shapes; batch >= 128 keeps the MXU rows reasonably utilized.
    batch, in_dim, hidden_dim, out_dim = 128, 32, 64, 32

    key = jax.random.PRNGKey(0)
    kx, kw1, kw2 = jax.random.split(key, 3)

    x = jax.random.normal(kx, (batch, in_dim), dtype=jnp.float32)

    # Deterministic init (Kaiming-uniform-like Linear scale; BN gamma=1, beta=0).
    bound1 = 1.0 / (in_dim ** 0.5)
    bound2 = 1.0 / (hidden_dim ** 0.5)
    w1 = jax.random.uniform(kw1, (hidden_dim, in_dim), jnp.float32, -bound1, bound1)
    w2 = jax.random.uniform(kw2, (out_dim, hidden_dim), jnp.float32, -bound2, bound2)
    gamma1 = jnp.ones((hidden_dim,), jnp.float32)
    beta1 = jnp.zeros((hidden_dim,), jnp.float32)

    out = jax.block_until_ready(projection_mlp(x, w1, gamma1, beta1, w2))

    ref = projection_mlp_ref(x, w1, gamma1, beta1, w2)
    assert out.shape == (batch, out_dim)
    max_err = float(jnp.max(jnp.abs(out - ref)))
    assert jnp.allclose(out, ref, atol=1e-2, rtol=1e-2), max_err

    print("KERNEL_OK")
</pallas_src>

<mosaic_0001>
module attributes {stable_mosaic.version = 11 : i64} {
  func.func @_linear_bn_relu_kernel(%arg0: i32, %arg1: i32, %arg2: memref<128x128xbf16, #tpu.memory_space<vmem>>, %arg3: memref<128x128xbf16, #tpu.memory_space<vmem>>, %arg4: memref<1x128xf32, #tpu.memory_space<vmem>>, %arg5: memref<1x128xf32, #tpu.memory_space<vmem>>, %arg6: memref<128x128xbf16, #tpu.memory_space<vmem>>, %arg7: memref<128x128xf32, #tpu.memory_space<vmem>>) attributes {dimension_semantics = [#tpu.dimension_semantics<parallel>, #tpu.dimension_semantics<arbitrary>], iteration_bounds = array<i64: 1, 1>, scalar_prefetch = 0 : i64, scratch_operands = 1 : i64, tpu.core_type = #tpu.core_type<tc>, window_params = [{transform_indices = @transform_0, window_bounds = array<i64: 128, 128>}, {transform_indices = @transform_1, window_bounds = array<i64: 128, 128>}, {transform_indices = @transform_2, window_bounds = array<i64: 1, 128>}, {transform_indices = @transform_3, window_bounds = array<i64: 1, 128>}, {transform_indices = @transform_4, window_bounds = array<i64: 128, 128>}]} {
    %c0_i32 = arith.constant 0 : i32
    %0 = arith.cmpi eq, %arg1, %c0_i32 : i32
    %1 = arith.extui %0 : i1 to i32
    %c0_i32_0 = arith.constant 0 : i32
    %2 = arith.cmpi ne, %1, %c0_i32_0 : i32
    scf.if %2 {
      %cst_10 = arith.constant 0.000000e+00 : f32
      %12 = vector.broadcast %cst_10 : f32 to vector<128x128xf32>
      %c0_11 = arith.constant 0 : index
      %c0_12 = arith.constant 0 : index
      %13 = vector.load %arg7[%c0_11, %c0_12] : memref<128x128xf32, #tpu.memory_space<vmem>>, vector<128x128xf32>
      tpu.vector_store %arg7[%c0_11, %c0_12], %12 {strides = array<i32>} : memref<128x128xf32, #tpu.memory_space<vmem>>, vector<128x128xf32>,
    } else {
    }
    %c0 = arith.constant 0 : index
    %c0_1 = arith.constant 0 : index
    %3 = vector.load %arg7[%c0, %c0_1] : memref<128x128xf32, #tpu.memory_space<vmem>>, vector<128x128xf32>
    %c0_2 = arith.constant 0 : index
    %c0_3 = arith.constant 0 : index
    %4 = vector.load %arg2[%c0_2, %c0_3] : memref<128x128xbf16, #tpu.memory_space<vmem>>, vector<128x128xbf16>
    %c0_4 = arith.constant 0 : index
    %c0_5 = arith.constant 0 : index
    %5 = vector.load %arg3[%c0_4, %c0_5] : memref<128x128xbf16, #tpu.memory_space<vmem>>, vector<128x128xbf16>
    %cst = arith.constant dense<0.000000e+00> : vector<128x128xf32>
    %6 = tpu.matmul %4, %5, %cst {dimension_numbers = #tpu.dot_dimension_numbers<[1], [0], [0], [1], [0, 0, 1, 1], [], []>} : vector<128x128xbf16>, vector<128x128xbf16>, vector<128x128xf32> -> vector<128x128xf32>
    %7 = arith.addf %3, %6 : vector<128x128xf32>
    %c0_6 = arith.constant 0 : index
    %c0_7 = arith.constant 0 : index
    %8 = vector.load %arg7[%c0_6, %c0_7] : memref<128x128xf32, #tpu.memory_space<vmem>>, vector<128x128xf32>
    tpu.vector_store %arg7[%c0_6, %c0_7], %7 {strides = array<i32>} : memref<128x128xf32, #tpu.memory_space<vmem>>, vector<128x128xf32>,
    %c0_i32_8 = arith.constant 0 : i32
    %9 = arith.cmpi eq, %arg1, %c0_i32_8 : i32
    %10 = arith.extui %9 : i1 to i32
    %c0_i32_9 = arith.constant 0 : i32
    %11 = arith.cmpi ne, %10, %c0_i32_9 : i32
    scf.if %11 {
      %c0_10 = arith.constant 0 : index
      %c0_11 = arith.constant 0 : index
      %12 = vector.load %arg7[%c0_10, %c0_11] : memref<128x128xf32, #tpu.memory_space<vmem>>, vector<128x128xf32>
      %cst_12 = arith.constant dense<0.000000e+00> : vector<128xf32>
      %13 = vector.multi_reduction <add>, %12, %cst_12 [0] : vector<128x128xf32> to vector<128xf32>
      %14 = vector.shape_cast %13 : vector<128xf32> to vector<1x128xf32>
      %cst_13 = arith.constant 1.280000e+02 : f32
      %15 = vector.broadcast %cst_13 : f32 to vector<1x128xf32>
      %16 = arith.divf %14, %15 : vector<1x128xf32>
      %17 = vector.broadcast %16 : vector<1x128xf32> to vector<128x128xf32>
      %18 = arith.subf %12, %17 : vector<128x128xf32>
      %19 = arith.mulf %18, %18 : vector<128x128xf32>
      %cst_14 = arith.constant dense<0.000000e+00> : vector<128xf32>
      %20 = vector.multi_reduction <add>, %19, %cst_14 [0] : vector<128x128xf32> to vector<128xf32>
      %21 = vector.shape_cast %20 : vector<128xf32> to vector<1x128xf32>
      %cst_15 = arith.constant 1.280000e+02 : f32
      %22 = vector.broadcast %cst_15 : f32 to vector<1x128xf32>
      %23 = arith.divf %21, %22 : vector<1x128xf32>
      %c0_16 = arith.constant 0 : index
      %c0_17 = arith.constant 0 : index
      %24 = vector.load %arg4[%c0_16, %c0_17] : memref<1x128xf32, #tpu.memory_space<vmem>>, vector<1x128xf32>
      %cst_18 = arith.constant 9.99999974E-6 : f32
      %25 = vector.broadcast %cst_18 : f32 to vector<1x128xf32>
      %26 = arith.addf %23, %25 : vector<1x128xf32>
      %27 = math.rsqrt %26 : vector<1x128xf32>
      %28 = arith.mulf %24, %27 : vector<1x128xf32>
      %c0_19 = arith.constant 0 : index
      %c0_20 = arith.constant 0 : index
      %29 = vector.load %arg5[%c0_19, %c0_20] : memref<1x128xf32, #tpu.memory_space<vmem>>, vector<1x128xf32>
      %30 = arith.mulf %16, %28 : vector<1x128xf32>
      %31 = arith.subf %29, %30 : vector<1x128xf32>
      %32 = vector.broadcast %28 : vector<1x128xf32> to vector<128x128xf32>
      %33 = arith.mulf %12, %32 : vector<128x128xf32>
      %34 = vector.broadcast %31 : vector<1x128xf32> to vector<128x128xf32>
      %35 = arith.addf %33, %34 : vector<128x128xf32>
      %cst_21 = arith.constant 0.000000e+00 : f32
      %36 = vector.broadcast %cst_21 : f32 to vector<128x128xf32>
      %37 = arith.maximumf %35, %36 : vector<128x128xf32>
      %38 = arith.truncf %37 : vector<128x128xf32> to vector<128x128xbf16>
      %c0_22 = arith.constant 0 : index
      %c0_23 = arith.constant 0 : index
      %39 = vector.load %arg6[%c0_22, %c0_23] : memref<128x128xbf16, #tpu.memory_space<vmem>>, vector<128x128xbf16>
      tpu.vector_store %arg6[%c0_22, %c0_23], %38 {strides = array<i32>} : memref<128x128xbf16, #tpu.memory_space<vmem>>, vector<128x128xbf16>,
    } else {
    }
    return
  }
  func.func @transform_0(%arg0: i32, %arg1: i32) -> (i32, i32) {
    %c0_i32 = arith.constant 0 : i32
    %c0_i32_0 = arith.constant 0 : i32
    return %c0_i32, %arg1 : i32, i32
  }
  func.func @transform_1(%arg0: i32, %arg1: i32) -> (i32, i32) {
    %c0_i32 = arith.constant 0 : i32
    return %arg1, %arg0 : i32, i32
  }
  func.func @transform_2(%arg0: i32, %arg1: i32) -> (i32, i32) {
    %c0_i32 = arith.constant 0 : i32
    %c0_i32_0 = arith.constant 0 : i32
    return %c0_i32, %arg0 : i32, i32
  }
  func.func @transform_3(%arg0: i32, %arg1: i32) -> (i32, i32) {
    %c0_i32 = arith.constant 0 : i32
    %c0_i32_0 = arith.constant 0 : i32
    return %c0_i32, %arg0 : i32, i32
  }
  func.func @transform_4(%arg0: i32, %arg1: i32) -> (i32, i32) {
    %c0_i32 = arith.constant 0 : i32
    %c0_i32_0 = arith.constant 0 : i32
    return %c0_i32, %arg0 : i32, i32
  }
}

</mosaic_0001>

<bundles_post_ra>
// kernel: tpu_custom_call.1
= control target key start
LH: loop header
LB: loop body
LE: loop exit
PB: predicated region body
PF: predicated region fallthrough
CT: control target
= control target key end

     0   :  { %9 = vsyncpa [#allocation4], 0  ;;  %s912_s0 = inlined_call_operand.hbm [shape: bf16[128,128], index: 0, kind: input, shape index: {}]   ;;  %s913_s1 = inlined_call_operand.hbm [shape: bf16[128,128], index: 1, kind: input, shape index: {}]   ;;  %s914_s2 = inlined_call_operand.vmem [shape: f32[1,128], index: 2, kind: input, shape index: {}]   ;;  %s915_s3 = inlined_call_operand.vmem [shape: f32[1,128], index: 3, kind: input, shape index: {}]   ;;  %s916_s4 = inlined_call_operand.hbm [shape: bf16[128,128], index: 4, kind: output, shape index: {}]  }
   0x1   :  { %10 = vsyncpa [#allocation7], 0 }
   0x2   :  { %11 = vsyncpa [#allocation5], 0  ;;  %s16_s17 = sshll.u32 %s912_s0, 4  ;;  %s758_s18 = smov [#allocation3]   ;;  %s17_s17 = int_to_ptr.hbm [resolvable:$true] %s16_s17 }
   0x3   :  { %s18_s19 = sshll.u32 %s758_s18, 4  ;;  %s29_s22 = sshll.u32 %s913_s1, 4  ;;  %s19_s19 = int_to_ptr.vmem [resolvable:$true] %s18_s19  ;;  %s30_s22 = int_to_ptr.hbm [resolvable:$true] %s29_s22 }
   0x4   :  { %s759_s23 = smov 64   ;;  %s760_s24 = smov 4  }
   0x5   :  { %24 = dma.hbm_to_vmem [thread:$0]  %s17_s17, 1024, %s19_s19, [#allocation4], %s759_s23, %s759_s23, %s760_s24  }
   0x6   :  { %s761_s25 = smov [#allocation6]  }
   0x7   :  { %s31_s26 = sshll.u32 %s761_s25, 4  ;;  %s32_s26 = int_to_ptr.vmem [resolvable:$true] %s31_s26 }
   0x8   :  { %37 = dma.hbm_to_vmem [thread:$0]  %s30_s22, 1024, %s32_s26, [#allocation7], %s759_s23, %s759_s23, %s760_s24  }
   0x9   :  { %752 = dma.done.wait [#allocation4], 1024  }
   0xa   :  { %753 = vsyncadd [#allocation4], 4294966272 }
   0xb   :  { %754 = dma.done.wait [#allocation7], 1024  }
   0xc   :  { %755 = vsyncadd [#allocation7], 4294966272  ;;  %v598_v0 = vld [vmem:[#allocation6 + $0x38] sm:$0xff]  ;;  %v597_v1 = vld [vmem:[#allocation6 + $0x30] sm:$0xff]  ;;  %v762_v37 = vmov 128.0   ;;  %s505_s5 = sshll.u32 %s916_s4, 4  ;;  %s506_s5 = int_to_ptr.hbm [resolvable:$true] %s505_s5 }
   0xd   :  { %214 = vmatpush.bf16.msra.mxu0 %v598_v0  ;;  %646 = vmatpush.bf16.msra.mxu1 %v598_v0  ;;  %v596_v2 = vld [vmem:[#allocation6 + $0x28] sm:$0xff]  ;;  %v595_v3 = vld [vmem:[#allocation6 + $0x20] sm:$0xff]  ;;  %v594_v4 = vld [vmem:[#allocation6 + $0x18] sm:$0xff]  ;;  %676 = vrcp.f32 %v762_v37 }
   0xe   :  { %647 = vmatpush.bf16.msra.mxu2 %v598_v0  ;;  %648 = vmatpush.bf16.msra.mxu3 %v598_v0  ;;  %v593_v5 = vld [vmem:[#allocation6 + $0x10] sm:$0xff]  ;;  %v592_v6 = vld [vmem:[#allocation6 + $0x8] sm:$0xff]  ;;  %v591_v7 = vld [vmem:[#allocation6] sm:$0xff] }
   0xf   :  { %v583_v8 = vld [vmem:[#allocation3] sm:$0xff]  ;;  %v585_v9 = vld [vmem:[#allocation3 + $0x10] sm:$0xff]  ;;  %v584_v12 = vld [vmem:[#allocation3 + $0x8] sm:$0xff] }
  0x10   :  { %v587_v10 = vld [vmem:[#allocation3 + $0x20] sm:$0xff]  ;;  %v589_v11 = vld [vmem:[#allocation3 + $0x30] sm:$0xff]  ;;  %v586_v13 = vld [vmem:[#allocation3 + $0x18] sm:$0xff] }
  0x11   :  { %215 = vmatpush.bf16.msra.mxu0 %v597_v1  ;;  %649 = vmatpush.bf16.msra.mxu1 %v597_v1  ;;  %v588_v14 = vld [vmem:[#allocation3 + $0x28] sm:$0xff]  ;;  %v590_v15 = vld [vmem:[#allocation3 + $0x38] sm:$0xff] }
  0x12   :  { %650 = vmatpush.bf16.msra.mxu2 %v597_v1  ;;  %651 = vmatpush.bf16.msra.mxu3 %v597_v1 }
  0x13   :  { %v677_v42 = vpop.eup %676 }
  0x14   :  { %v336_v45 = vmul.f32 128.0, %v677_v42  ;;  %vm340_vm0 = vweird.f32 %v677_v42 }
  0x15   :  { %216 = vmatpush.bf16.msra.mxu0 %v596_v2  ;;  %652 = vmatpush.bf16.msra.mxu1 %v596_v2 }
  0x16   :  { %653 = vmatpush.bf16.msra.mxu2 %v596_v2  ;;  %654 = vmatpush.bf16.msra.mxu3 %v596_v2  ;;  %v337_v49 = vsub.f32 1.0, %v336_v45 }
  0x18   :  { %v338_v52 = vmul.f32 %v677_v42, %v337_v49 }
  0x19   :  { %217 = vmatpush.bf16.msra.mxu0 %v595_v3  ;;  %655 = vmatpush.bf16.msra.mxu1 %v595_v3 }
  0x1a   :  { %656 = vmatpush.bf16.msra.mxu2 %v595_v3  ;;  %657 = vmatpush.bf16.msra.mxu3 %v595_v3  ;;  %v339_v55 = vadd.f32 %v677_v42, %v338_v52 }
  0x1c   :  { %v341_v58 = vsel %vm340_vm0, %v677_v42, %v339_v55 }
  0x1d   :  { %218 = vmatpush.bf16.msra.mxu0 %v594_v4  ;;  %658 = vmatpush.bf16.msra.mxu1 %v594_v4 }
  0x1e   :  { %659 = vmatpush.bf16.msra.mxu2 %v594_v4  ;;  %660 = vmatpush.bf16.msra.mxu3 %v594_v4 }
  0x21   :  { %219 = vmatpush.bf16.msra.mxu0 %v593_v5  ;;  %661 = vmatpush.bf16.msra.mxu1 %v593_v5 }
  0x22   :  { %662 = vmatpush.bf16.msra.mxu2 %v593_v5  ;;  %663 = vmatpush.bf16.msra.mxu3 %v593_v5 }
  0x25   :  { %220 = vmatpush.bf16.msra.mxu0 %v592_v6  ;;  %664 = vmatpush.bf16.msra.mxu1 %v592_v6 }
  0x26   :  { %665 = vmatpush.bf16.msra.mxu2 %v592_v6  ;;  %666 = vmatpush.bf16.msra.mxu3 %v592_v6 }
  0x29   :  { %221 = vmatpush.bf16.msra.mxu0 %v591_v7  ;;  %667 = vmatpush.bf16.msra.mxu1 %v591_v7 }
  0x2a   :  { %668 = vmatpush.bf16.msra.mxu2 %v591_v7  ;;  %669 = vmatpush.bf16.msra.mxu3 %v591_v7 }
  0x2c   :  { %222 = vmatmul.bf16.vlgmr.msra.gmra.mxu0 %v583_v8  ;;  %232 = vmatmul.bf16.vlgmr.msra.gmra.mxu1 %v585_v9 }
  0x2d   :  { %242 = vmatmul.bf16.vlgmr.msra.gmra.mxu2 %v587_v10  ;;  %252 = vmatmul.bf16.vlgmr.msra.gmra.mxu3 %v589_v11 }
  0x3c   :  { %227 = vmatmul.bf16.gmra.mxu0 %v584_v12  ;;  %237 = vmatmul.bf16.gmra.mxu1 %v586_v13 }
  0x3d   :  { %247 = vmatmul.bf16.gmra.mxu2 %v588_v14  ;;  %257 = vmatmul.bf16.gmra.mxu3 %v590_v15 }
  0xa9   :  { %v801_v16 = vpop.f32.mrf.mxu0  ;;  %v803_v17 = vpop.f32.mrf.mxu1 }
  0xb0   :  { %v807_v19 = vpop.f32.mrf.mxu2  ;;  %v813_v22 = vpop.f32.mrf.mxu3 }
  0xb1   :  { %v805_v18 = vpop.f32.mrf.mxu0  ;;  %v809_v20 = vpop.f32.mrf.mxu1 }
  0xb2   :  { %v314_v24 = vadd.f32 %v805_v18, %v801_v16 }
  0xb8   :  { %v815_v23 = vpop.f32.mrf.mxu2  ;;  %v826_v30 = vpop.f32.mrf.mxu3 }
  0xb9   :  { %v811_v21 = vpop.f32.mrf.mxu0  ;;  %v819_v25 = vpop.f32.mrf.mxu1 }
  0xba   :  { %v315_v26 = vadd.f32 %v314_v24, %v811_v21 }
  0xc0   :  { %v829_v32 = vpop.f32.mrf.mxu2  ;;  %v837_v39 = vpop.f32.mrf.mxu3 }
  0xc1   :  { %v822_v27 = vpop.f32.mrf.mxu0  ;;  %v832_v34 = vpop.f32.mrf.mxu1 }
  0xc2   :  { %v316_v28 = vadd.f32 %v315_v26, %v822_v27 }
  0xc4   :  { %v317_v29 = vadd.f32 %v316_v28, %v803_v17 }
  0xc6   :  { %v318_v31 = vadd.f32 %v317_v29, %v809_v20 }
  0xc8   :  { %v319_v33 = vadd.f32 %v318_v31, %v819_v25  ;;  %v840_v41 = vpop.f32.mrf.mxu2  ;;  %v846_v48 = vpop.f32.mrf.mxu3 }
  0xca   :  { %v320_v35 = vadd.f32 %v319_v33, %v832_v34 }
  0xcc   :  { %v321_v36 = vadd.f32 %v320_v35, %v807_v19 }
  0xce   :  { %v322_v38 = vadd.f32 %v321_v36, %v815_v23 }
  0xd0   :  { %v323_v40 = vadd.f32 %v322_v38, %v829_v32 }
  0xd2   :  { %v324_v43 = vadd.f32 %v323_v40, %v840_v41 }
  0xd4   :  { %v325_v44 = vadd.f32 %v324_v43, %v813_v22 }
  0xd6   :  { %v326_v46 = vadd.f32 %v325_v44, %v826_v30 }
  0xd8   :  { %v327_v47 = vadd.f32 %v326_v46, %v837_v39 }
  0xda   :  { %v328_v50 = vadd.f32 %v327_v47, %v846_v48 }
  0xdc   :  { %v329_v51 = vrot.slane %v328_v50, 4 }
  0xde   :  { %v330_v53 = vadd.f32 %v329_v51, %v328_v50 }
  0xe0   :  { %v331_v54 = vrot.slane %v330_v53, 2 }
  0xe2   :  { %v332_v56 = vadd.f32 %v331_v54, %v330_v53 }
  0xe4   :  { %v333_v57 = vrot.slane %v332_v56, 1 }
  0xe6   :  { %v334_v59 = vadd.f32 %v333_v57, %v332_v56 }
  0xe8   :  { %v849_v60 = vmul.f32 %v341_v58, %v334_v59 }
  0xea   :  { %v343_v61 = vsub.f32 %v801_v16, %v849_v60  ;;  %v344_v62 = vsub.f32 %v805_v18, %v849_v60  ;;  %v345_v63 = vsub.f32 %v811_v21, %v849_v60  ;;  %v346_v2 = vsub.f32 %v822_v27, %v849_v60 }
  0xeb   :  { %v347_v3 = vsub.f32 %v803_v17, %v849_v60  ;;  %v348_v6 = vsub.f32 %v809_v20, %v849_v60  ;;  %v349_v9 = vsub.f32 %v819_v25, %v849_v60  ;;  %v350_v12 = vsub.f32 %v832_v34, %v849_v60 }
  0xec   :  { %v359_v0 = vmul.f32 %v343_v61, %v343_v61  ;;  %v360_v1 = vmul.f32 %v344_v62, %v344_v62  ;;  %v361_v4 = vmul.f32 %v345_v63, %v345_v63  ;;  %v362_v7 = vmul.f32 %v346_v2, %v346_v2 }
  0xed   :  { %v363_v10 = vmul.f32 %v347_v3, %v347_v3  ;;  %v364_v13 = vmul.f32 %v348_v6, %v348_v6  ;;  %v351_v15 = vsub.f32 %v807_v19, %v849_v60  ;;  %v365_v24 = vmul.f32 %v349_v9, %v349_v9 }
  0xee   :  { %v375_v5 = vadd.f32 %v360_v1, %v359_v0  ;;  %v352_v28 = vsub.f32 %v815_v23, %v849_v60  ;;  %v366_v29 = vmul.f32 %v350_v12, %v350_v12  ;;  %v353_v33 = vsub.f32 %v829_v32, %v849_v60 }
  0xef   :  { %v367_v35 = vmul.f32 %v351_v15, %v351_v15  ;;  %v354_v37 = vsub.f32 %v840_v41, %v849_v60  ;;  %v355_v42 = vsub.f32 %v813_v22, %v849_v60  ;;  %v356_v45 = vsub.f32 %v826_v30, %v849_v60 }
  0xf0   :  { %v376_v8 = vadd.f32 %v375_v5, %v361_v4  ;;  %v368_v38 = vmul.f32 %v352_v28, %v352_v28  ;;  %v369_v43 = vmul.f32 %v353_v33, %v353_v33  ;;  %v357_v49 = vsub.f32 %v837_v39, %v849_v60 }
  0xf1   :  { %v370_v46 = vmul.f32 %v354_v37, %v354_v37  ;;  %v371_v50 = vmul.f32 %v355_v42, %v355_v42  ;;  %v358_v52 = vsub.f32 %v846_v48, %v849_v60  ;;  %v372_v53 = vmul.f32 %v356_v45, %v356_v45 }
  0xf2   :  { %v377_v11 = vadd.f32 %v376_v8, %v362_v7  ;;  %v373_v55 = vmul.f32 %v357_v49, %v357_v49 }
  0xf3   :  { %v374_v57 = vmul.f32 %v358_v52, %v358_v52 }
  0xf4   :  { %v378_v14 = vadd.f32 %v377_v11, %v363_v10  ;;  %v397_v11 = vld [vmem:[%s914_s2] sm:$0x1]  ;;  %s763_s2 = smov [#allocation8]  }
  0xf6   :  { %v379_v26 = vadd.f32 %v378_v14, %v364_v13 }
  0xf8   :  { %v380_v31 = vadd.f32 %v379_v26, %v365_v24 }
  0xfa   :  { %v381_v36 = vadd.f32 %v380_v31, %v366_v29 }
  0xfc   :  { %v382_v40 = vadd.f32 %v381_v36, %v367_v35 }
  0xfe   :  { %v383_v44 = vadd.f32 %v382_v40, %v368_v38 }
 0x100   :  { %v384_v47 = vadd.f32 %v383_v44, %v369_v43 }
 0x102   :  { %v385_v51 = vadd.f32 %v384_v47, %v370_v46 }
 0x104   :  { %v386_v54 = vadd.f32 %v385_v51, %v371_v50 }
 0x106   :  { %v387_v56 = vadd.f32 %v386_v54, %v372_v53 }
 0x108   :  { %v388_v59 = vadd.f32 %v387_v56, %v373_v55 }
 0x10a   :  { %v389_v61 = vadd.f32 %v388_v59, %v374_v57 }
 0x10c   :  { %v390_v62 = vrot.slane %v389_v61, 4 }
 0x10e   :  { %v391_v63 = vadd.f32 %v390_v62, %v389_v61 }
 0x110   :  { %v392_v0 = vrot.slane %v391_v63, 2 }
 0x112   :  { %v393_v1 = vadd.f32 %v392_v0, %v391_v63 }
 0x114   :  { %v394_v2 = vrot.slane %v393_v1, 1 }
 0x116   :  { %v395_v3 = vadd.f32 %v394_v2, %v393_v1 }
 0x118   :  { %v396_v4 = vmul.f32 %v395_v3, %v341_v58  ;;  %v410_v58 = vld [vmem:[%s915_s3] sm:$0x1]  ;;  %s503_s3 = sshll.u32 %s763_s2, 4  ;;  %s504_s3 = int_to_ptr.vmem [resolvable:$true] %s503_s3 }
 0x11a   :  { %v398_v5 = vadd.f32 1e-05, %v396_v4 }
 0x11c   :  { %678 = vrsqrt.f32 %v398_v5  ;;  %vm405_vm2 = vweird.f32 %v398_v5 }
 0x122   :  { %v679_v6 = vpop.eup %678 }
 0x123   :  { %v400_v7 = vmul.f32 %v679_v6, %v398_v5  ;;  %vm406_vm1 = vweird.f32 %v679_v6 }
 0x124   :  { %vm407_vm3 = vmor %vm405_vm2, %vm406_vm1 }
 0x125   :  { %v401_v8 = vmul.f32 %v679_v6, %v400_v7 }
 0x127   :  { %v402_v9 = vmul.f32 0.5, %v401_v8 }
 0x129   :  { %v403_v10 = vsub.f32 1.5, %v402_v9 }
 0x12b   :  { %v404_v12 = vmul.f32 %v679_v6, %v403_v10 }
 0x12d   :  { %v408_v13 = vsel %vm407_vm3, %v679_v6, %v404_v12 }
 0x12e   :  { %v409_v14 = vmul.f32 %v408_v13, %v397_v11 }
 0x130   :  { %v411_v15 = vmul.f32 %v409_v14, %v849_v60  ;;  %v414_v24 = vperm.slane %v409_v14, 0 }
 0x132   :  { %v412_v26 = vsub.f32 %v410_v58, %v411_v15  ;;  %v430_v28 = vmul.f32 %v414_v24, %v837_v39  ;;  %v431_v29 = vmul.f32 %v414_v24, %v846_v48  ;;  %v416_v31 = vmul.f32 %v414_v24, %v801_v16 }
 0x133   :  { %v417_v33 = vmul.f32 %v414_v24, %v805_v18  ;;  %v418_v35 = vmul.f32 %v414_v24, %v811_v21  ;;  %v419_v36 = vmul.f32 %v414_v24, %v822_v27  ;;  %v420_v37 = vmul.f32 %v414_v24, %v803_v17 }
 0x134   :  { %v433_v38 = vperm.slane %v412_v26, 0  ;;  %v421_v40 = vmul.f32 %v414_v24, %v809_v20  ;;  %v422_v60 = vmul.f32 %v414_v24, %v819_v25  ;;  %v423_v42 = vmul.f32 %v414_v24, %v832_v34 }
 0x135   :  { %v424_v39 = vmul.f32 %v414_v24, %v807_v19  ;;  %v425_v48 = vmul.f32 %v414_v24, %v815_v23  ;;  %v426_v16 = vmul.f32 %v414_v24, %v829_v32  ;;  %v427_v18 = vmul.f32 %v414_v24, %v840_v41 }
 0x136   :  { %v449_v21 = vadd.f32 %v433_v38, %v430_v28  ;;  %v450_v43 = vadd.f32 %v433_v38, %v431_v29  ;;  %v428_v27 = vmul.f32 %v414_v24, %v813_v22  ;;  %v429_v17 = vmul.f32 %v414_v24, %v826_v30 }
 0x137   :  { %v435_v44 = vadd.f32 %v433_v38, %v416_v31  ;;  %v436_v20 = vadd.f32 %v433_v38, %v417_v33  ;;  %v437_v45 = vadd.f32 %v433_v38, %v418_v35  ;;  %v438_v25 = vadd.f32 %v433_v38, %v419_v36 }
 0x138   :  { %v465_v46 = vmax.f32 %v449_v21, 0.0  ;;  %v466_v34 = vmax.f32 %v450_v43, 0.0  ;;  %v439_v47 = vadd.f32 %v433_v38, %v420_v37  ;;  %v440_v19 = vadd.f32 %v433_v38, %v421_v40 }
 0x139   :  { %v441_v49 = vadd.f32 %v433_v38, %v422_v60  ;;  %v442_v23 = vadd.f32 %v433_v38, %v423_v42  ;;  %v443_v50 = vadd.f32 %v433_v38, %v424_v39  ;;  %v444_v32 = vadd.f32 %v433_v38, %v425_v48 }
 0x13a   :  { %v637_v51 = vpack.c.bf16 %v466_v34, %v465_v46  ;;  %v445_v41 = vadd.f32 %v433_v38, %v426_v16  ;;  %v446_v52 = vadd.f32 %v433_v38, %v427_v18  ;;  %v447_v53 = vadd.f32 %v433_v38, %v428_v27 }
 0x13b   :  { %v448_v54 = vadd.f32 %v433_v38, %v429_v17  ;;  %v451_v22 = vmax.f32 %v435_v44, 0.0  ;;  %v452_v55 = vmax.f32 %v436_v20, 0.0  ;;  %v453_v30 = vmax.f32 %v437_v45, 0.0 }
 0x13c   :  { %645 = vst [vmem:[#allocation8 + $0x38] sm:$0xff] %v637_v51   ;;  %v454_v56 = vmax.f32 %v438_v25, 0.0  ;;  %v455_v57 = vmax.f32 %v439_v47, 0.0  ;;  %v456_v59 = vmax.f32 %v440_v19, 0.0  ;;  %v457_v61 = vmax.f32 %v441_v49, 0.0 }
 0x13d   :  { %v458_v62 = vmax.f32 %v442_v23, 0.0  ;;  %v459_v63 = vmax.f32 %v443_v50, 0.0  ;;  %v460_v0 = vmax.f32 %v444_v32, 0.0  ;;  %v461_v1 = vmax.f32 %v445_v41, 0.0 }
 0x13e   :  { %v462_v2 = vmax.f32 %v446_v52, 0.0  ;;  %v463_v3 = vmax.f32 %v447_v53, 0.0  ;;  %v464_v4 = vmax.f32 %v448_v54, 0.0  ;;  %v602_v5 = vpack.c.bf16 %v452_v55, %v451_v22 }
 0x13f   :  { %v607_v6 = vpack.c.bf16 %v454_v56, %v453_v30  ;;  %v612_v7 = vpack.c.bf16 %v456_v59, %v455_v57  ;;  %v617_v8 = vpack.c.bf16 %v458_v62, %v457_v61  ;;  %v622_v9 = vpack.c.bf16 %v460_v0, %v459_v63 }
 0x140   :  { %603 = vst [vmem:[#allocation8] sm:$0xff] %v602_v5   ;;  %v627_v10 = vpack.c.bf16 %v462_v2, %v461_v1  ;;  %v632_v11 = vpack.c.bf16 %v464_v4, %v463_v3 }
 0x141   :  { %639 = vst [vmem:[#allocation8 + $0x8] sm:$0xff] %v607_v6  }
 0x142   :  { %640 = vst [vmem:[#allocation8 + $0x10] sm:$0xff] %v612_v7  }
 0x143   :  { %641 = vst [vmem:[#allocation8 + $0x18] sm:$0xff] %v617_v8  }
 0x144   :  { %642 = vst [vmem:[#allocation8 + $0x20] sm:$0xff] %v622_v9  }
 0x145   :  { %643 = vst [vmem:[#allocation8 + $0x28] sm:$0xff] %v627_v10  }
 0x146   :  { %644 = vst [vmem:[#allocation8 + $0x30] sm:$0xff] %v632_v11  }
 0x147   :  { %511 = dma.vmem_to_hbm [thread:$0]  %s504_s3, 1024, %s506_s5, [#allocation5], %s759_s23, %s759_s23, %s760_s24  }
 0x148   :  { %756 = dma.done.wait [#allocation5], 1024  }
 0x149   :  { %757 = vsyncadd [#allocation5], 4294966272 }
 0x14a   :  { %516 = vsyncpa [#allocation4], 1 }
 0x14b   :  { %517 = vsyncpa [#allocation7], 1 }
 0x14c   :  { %518 = vsyncpa [#allocation5], 1 }

</bundles_post_ra>
